<compile_context>
chip_gen: v6e
topology: v6e:2x2x1
jax: 0.10.0
libtpu: 0.0.40
codegen_flags: <defaults>
</compile_context>

<pallas_src>
import jax
import jax.numpy as jnp
from jax.experimental import pallas as pl
from jax.experimental.pallas import tpu as pltpu


# ---------------------------------------------------------------------------
# Pallas kernels
# ---------------------------------------------------------------------------

def conv_kernel(p_ref, w_ref, b_ref, o_ref):
    """im2col conv tile:  relu(patches @ Wc + bc).

    p:(tile_r, 27)  Wc:(27, 24)  bc:(1, 24)  o:(tile_r, 24)
    """
    acc = jnp.dot(p_ref[...], w_ref[...], preferred_element_type=jnp.float32)
    o_ref[...] = jnp.maximum(acc + b_ref[...], 0.0)


def tsf_head_kernel(x_ref,
                    w0_ref, b0_ref,
                    w1_ref, b1_ref,
                    w2_ref, b2_ref,
                    w3_ref, b3_ref,
                    o_ref):
    """Fused TSF head: (tile_b,1536) -> 128 -> 64 -> 32 -> 2, ReLU between.

    The first matmul is the merged (lane-dense, 128-wide) branch weight, so the
    only non-trivial K (1536) is contracted in a single MXU pass sequence.
    """
    x = x_ref[...]
    h = jnp.maximum(
        jnp.dot(x, w0_ref[...], preferred_element_type=jnp.float32) + b0_ref[...], 0.0)
    h = jnp.maximum(
        jnp.dot(h, w1_ref[...], preferred_element_type=jnp.float32) + b1_ref[...], 0.0)
    h = jnp.maximum(
        jnp.dot(h, w2_ref[...], preferred_element_type=jnp.float32) + b2_ref[...], 0.0)
    o_ref[...] = (
        jnp.dot(h, w3_ref[...], preferred_element_type=jnp.float32) + b3_ref[...])


# ---------------------------------------------------------------------------
# Host-side glue
# ---------------------------------------------------------------------------

def _full_spec(shape):
    nd = len(shape)
    return pl.BlockSpec(shape, lambda i, _nd=nd: (0,) * _nd)


def im2col_nhwc(img, k=3, stride=2, pad=1):
    """(B,C,H,W) NCHW -> patches (B*Ho*Wo, k*k*C); feature order (kh, kw, cin).

    The feature order is folded into the conv-weight rows, so no extra
    transpose is needed anywhere downstream.
    """
    B, C, H, W = img.shape
    Ho = (H + 2 * pad - k) // stride + 1
    Wo = (W + 2 * pad - k) // stride + 1
    x = jnp.transpose(img, (0, 2, 3, 1))                         # NHWC (tiny)
    x = jnp.pad(x, ((0, 0), (pad, pad), (pad, pad), (0, 0)))
    cols = [x[:, i:i + stride * Ho:stride, j:j + stride * Wo:stride, :]
            for i in range(k) for j in range(k)]                 # each (B,Ho,Wo,C)
    patches = jnp.concatenate(cols, axis=-1)                     # (B,Ho,Wo,k*k*C)
    return patches.reshape(B * Ho * Wo, k * k * C), Ho, Wo


def cnn_tsf_forward(img, params):
    B = img.shape[0]
    patches, Ho, Wo = im2col_nhwc(img)
    R, Kf = patches.shape                    # (B*Ho*Wo, 27)
    Cout = params["w_conv"].shape[1]         # 24

    # --- conv stage -------------------------------------------------------
    tile_r = 512 if R % 512 == 0 else R
    conv_out = pl.pallas_call(
        conv_kernel,
        out_shape=jax.ShapeDtypeStruct((R, Cout), jnp.float32),
        grid=(R // tile_r,),
        in_specs=[pl.BlockSpec((tile_r, Kf), lambda i: (i, 0)),
                  _full_spec(params["w_conv"].shape),
                  _full_spec(params["b_conv"].shape)],
        out_specs=pl.BlockSpec((tile_r, Cout), lambda i: (i, 0)),
        compiler_params=pltpu.CompilerParams(dimension_semantics=("parallel",)),
        cost_estimate=pl.CostEstimate(
            flops=2 * R * Kf * Cout, transcendentals=0,
            bytes_accessed=4 * (R * Kf + Kf * Cout + R * Cout)),
    )(patches, params["w_conv"], params["b_conv"])

    # Zero-copy row-major reshape: (B*Ho*Wo, Cout) -> (B, Ho*Wo*Cout).
    # Head weight rows are stored in this NHWC-flatten order (h, w, c), so no
    # transpose of the activations is ever performed.
    x_flat = conv_out.reshape(B, Ho * Wo * Cout)
    F = x_flat.shape[1]                      # 1536

    # --- fused TSF head ----------------------------------------------------
    head_args = (x_flat,
                 params["w0"], params["b0"],
                 params["w1"], params["b1"],
                 params["w2"], params["b2"],
                 params["w3"], params["b3"])
    flops = 2 * B * (F * 128 + 128 * 64 + 64 * 32 + 32 * 2)
    bytes_acc = 4 * (B * F + F * 128 + 128 * 64 + 64 * 32 + 32 * 2
                     + 128 + 64 + 32 + 2 + B * 2)

    tile_b = 256 if B % 256 == 0 else B
    out = pl.pallas_call(
        tsf_head_kernel,
        out_shape=jax.ShapeDtypeStruct((B, 2), jnp.float32),
        grid=(B // tile_b,),
        in_specs=[pl.BlockSpec((tile_b, F), lambda i: (i, 0))]
                 + [_full_spec(a.shape) for a in head_args[1:]],
        out_specs=pl.BlockSpec((tile_b, 2), lambda i: (i, 0)),
        compiler_params=pltpu.CompilerParams(dimension_semantics=("parallel",)),
        cost_estimate=pl.CostEstimate(
            flops=flops, transcendentals=0, bytes_accessed=bytes_acc),
    )(*head_args)
    return out


# ---------------------------------------------------------------------------
# Deterministic parameter init (PyTorch-style uniform(-1/sqrt(fan_in), ...))
# ---------------------------------------------------------------------------

def init_params(key):
    ks = jax.random.split(key, 10)

    def u(k, shape, fan_in):
        bound = 1.0 / jnp.sqrt(jnp.float32(fan_in))
        return jax.random.uniform(k, shape, jnp.float32, -bound, bound)

    F = 24 * 8 * 8  # 1536
    return {
        # Conv weight rows ordered (kh, kw, cin):
        #   w_conv == torch_conv_w.permute(2, 3, 1, 0).reshape(27, 24)
        "w_conv": u(ks[0], (27, 24), 27),
        "b_conv": u(ks[1], (1, 24), 27),
        # TSF first layer, rows in NHWC-flatten order ((h*8+w)*24 + c):
        #   w0 == torch_w0.T with rows permuted from NCHW order (c*64+h*8+w).
        "w0": u(ks[2], (F, 128), F),
        "b0": u(ks[3], (1, 128), F),
        "w1": u(ks[4], (128, 64), 128),
        "b1": u(ks[5], (1, 64), 128),
        "w2": u(ks[6], (64, 32), 64),
        "b2": u(ks[7], (1, 32), 64),
        "w3": u(ks[8], (32, 2), 32),
        "b3": u(ks[9], (1, 2), 32),      # PyTorch-style bias init (was zeros)
    }


# ---------------------------------------------------------------------------
# Pure-JAX reference (also documents/asserts the weight-ordering contract)
# ---------------------------------------------------------------------------

def reference_forward(img, params):
    B = img.shape[0]
    hi = jax.lax.Precision.HIGHEST
    w = params["w_conv"].reshape(3, 3, 3, 24).transpose(3, 2, 0, 1)  # (Co,Ci,kh,kw)
    y = jax.lax.conv_general_dilated(
        img, w, window_strides=(2, 2), padding=((1, 1), (1, 1)),
        dimension_numbers=("NCHW", "OIHW", "NCHW"), precision=hi)
    y = jnp.maximum(y + params["b_conv"].reshape(1, 24, 1, 1), 0.0)
    x = jnp.transpose(y, (0, 2, 3, 1)).reshape(B, -1)   # NHWC flatten == w0 rows
    h = jnp.maximum(jnp.dot(x, params["w0"], precision=hi) + params["b0"], 0.0)
    h = jnp.maximum(jnp.dot(h, params["w1"], precision=hi) + params["b1"], 0.0)
    h = jnp.maximum(jnp.dot(h, params["w2"], precision=hi) + params["b2"], 0.0)
    return jnp.dot(h, params["w3"], precision=hi) + params["b3"]


if __name__ == "__main__":
    key = jax.random.PRNGKey(0)
    k_img, k_par = jax.random.split(key)

    # batch=2, RGB 16x16 image -> conv(stride 2) -> (2,24,8,8) -> TSF -> (2,2)
    img = jax.random.normal(k_img, (2, 3, 16, 16), jnp.float32)
    params = init_params(k_par)

    out = cnn_tsf_forward(img, params)
    out = jax.block_until_ready(out)
    assert out.shape == (2, 2), out.shape

    ref = jax.block_until_ready(reference_forward(img, params))
    assert bool(jnp.allclose(out, ref, rtol=2e-2, atol=2e-3)), (out, ref)

    print("KERNEL_OK")
</pallas_src>

<mosaic_0001>
module attributes {stable_mosaic.version = 11 : i64} {
  func.func @conv_kernel(%arg0: i32, %arg1: memref<128x27xf32, #tpu.memory_space<vmem>>, %arg2: memref<27x24xf32, #tpu.memory_space<vmem>>, %arg3: memref<1x24xf32, #tpu.memory_space<vmem>>, %arg4: memref<128x24xf32, #tpu.memory_space<vmem>>) attributes {dimension_semantics = [#tpu.dimension_semantics<parallel>], iteration_bounds = array<i64: 1>, scalar_prefetch = 0 : i64, scratch_operands = 0 : i64, tpu.core_type = #tpu.core_type<tc>, window_params = [{transform_indices = @transform_0, window_bounds = array<i64: 128, 27>}, {pipeline_mode = #tpu.pipeline_mode<synchronous>, transform_indices = @transform_1, window_bounds = array<i64: 27, 24>}, {pipeline_mode = #tpu.pipeline_mode<synchronous>, transform_indices = @transform_2, window_bounds = array<i64: 1, 24>}, {transform_indices = @transform_3, window_bounds = array<i64: 128, 24>}]} {
    %c0 = arith.constant 0 : index
    %c0_0 = arith.constant 0 : index
    %0 = vector.load %arg1[%c0, %c0_0] : memref<128x27xf32, #tpu.memory_space<vmem>>, vector<128x27xf32>
    %c0_1 = arith.constant 0 : index
    %c0_2 = arith.constant 0 : index
    %1 = vector.load %arg2[%c0_1, %c0_2] : memref<27x24xf32, #tpu.memory_space<vmem>>, vector<27x24xf32>
    %cst = arith.constant dense<0.000000e+00> : vector<128x24xf32>
    %2 = tpu.matmul %0, %1, %cst {dimension_numbers = #tpu.dot_dimension_numbers<[1], [0], [0], [1], [0, 0, 1, 1], [], []>} : vector<128x27xf32>, vector<27x24xf32>, vector<128x24xf32> -> vector<128x24xf32>
    %c0_3 = arith.constant 0 : index
    %c0_4 = arith.constant 0 : index
    %3 = vector.load %arg3[%c0_3, %c0_4] : memref<1x24xf32, #tpu.memory_space<vmem>>, vector<1x24xf32>
    %4 = vector.broadcast %3 : vector<1x24xf32> to vector<128x24xf32>
    %5 = arith.addf %2, %4 : vector<128x24xf32>
    %cst_5 = arith.constant 0.000000e+00 : f32
    %6 = vector.broadcast %cst_5 : f32 to vector<128x24xf32>
    %7 = arith.maximumf %5, %6 : vector<128x24xf32>
    %c0_6 = arith.constant 0 : index
    %c0_7 = arith.constant 0 : index
    %8 = vector.load %arg4[%c0_6, %c0_7] : memref<128x24xf32, #tpu.memory_space<vmem>>, vector<128x24xf32>
    tpu.vector_store %arg4[%c0_6, %c0_7], %7 {strides = array<i32>} : memref<128x24xf32, #tpu.memory_space<vmem>>, vector<128x24xf32>,
    return
  }
  func.func @transform_0(%arg0: i32) -> (i32, i32) {
    %c0_i32 = arith.constant 0 : i32
    %c0_i32_0 = arith.constant 0 : i32
    return %arg0, %c0_i32 : i32, i32
  }
  func.func @transform_1(%arg0: i32) -> (i32, i32) {
    %c0_i32 = arith.constant 0 : i32
    %c0_i32_0 = arith.constant 0 : i32
    %c0_i32_1 = arith.constant 0 : i32
    return %c0_i32, %c0_i32_0 : i32, i32
  }
  func.func @transform_2(%arg0: i32) -> (i32, i32) {
    %c0_i32 = arith.constant 0 : i32
    %c0_i32_0 = arith.constant 0 : i32
    %c0_i32_1 = arith.constant 0 : i32
    return %c0_i32, %c0_i32_0 : i32, i32
  }
  func.func @transform_3(%arg0: i32) -> (i32, i32) {
    %c0_i32 = arith.constant 0 : i32
    %c0_i32_0 = arith.constant 0 : i32
    return %arg0, %c0_i32 : i32, i32
  }
}

</mosaic_0001>

<bundles_post_ra>
// kernel: tpu_custom_call.1
= control target key start
LH: loop header
LB: loop body
LE: loop exit
PB: predicated region body
PF: predicated region fallthrough
CT: control target
= control target key end

     0   :  { %vm90_vm0 = vcmask 1042432   ;;  %vm41_vm1 = vcmask 220160   ;;  %vm255_vm2 = vcmask 195584   ;;  %s517_s1 = inlined_call_operand.vmem [shape: f32[27,24], index: 1, kind: input, shape index: {}]   ;;  %s518_s0 = inlined_call_operand.vmem [shape: f32[128,27], index: 0, kind: input, shape index: {}]   ;;  %s519_s2 = inlined_call_operand.vmem [shape: f32[1,24], index: 2, kind: input, shape index: {}]   ;;  %s520_s3 = inlined_call_operand.vmem [shape: f32[128,24], index: 3, kind: output, shape index: {}]  }
   0x1   :  { %v33_v0 = vld [vmem:[%s517_s1 + $0x18] sm:$0x7]  ;;  %v32_v1 = vld [vmem:[%s517_s1 + $0x10] sm:$0xff]  ;;  %v31_v2 = vld [vmem:[%s517_s1 + $0x8] sm:$0xff] }
   0x2   :  { %314 = vmatprep.subr.msk.mxu0 %vm90_vm0, %v33_v0  ;;  %346 = vmatprep.subr.msk.mxu1 %vm90_vm0, %v33_v0  ;;  %v30_v3 = vld [vmem:[%s517_s1] sm:$0xff]  ;;  %v15_v6 = vld [vmem:[%s518_s0 + $0x8] sm:$0xff]  ;;  %v16_v8 = vld [vmem:[%s518_s0 + $0x10] sm:$0xff] }
   0x3   :  { %315 = vmatpush3.msk.msra.mxu0 %vm90_vm0, %v33_v0  ;;  %350 = vmatpush3.msk.msra.mxu1 %vm90_vm0, %v33_v0  ;;  %v14_v4 = vld [vmem:[%s518_s0] sm:$0xff]  ;;  %v23_v7 = vld [vmem:[%s518_s0 + $0x48] sm:$0xff]  ;;  %v24_v9 = vld [vmem:[%s518_s0 + $0x50] sm:$0xff] }
   0x4   :  { %316 = vmatprep.subr.mxu0 %v32_v1  ;;  %347 = vmatprep.subr.mxu1 %v32_v1  ;;  %v22_v5 = vld [vmem:[%s518_s0 + $0x40] sm:$0xff]  ;;  %v17_v10 = vld [vmem:[%s518_s0 + $0x18] sm:$0xff]  ;;  %v19_v14 = vld [vmem:[%s518_s0 + $0x28] sm:$0xff] }
   0x5   :  { %317 = vmatpush3.msra.mxu0 %v32_v1  ;;  %351 = vmatpush3.msra.mxu1 %v32_v1  ;;  %v25_v11 = vld [vmem:[%s518_s0 + $0x58] sm:$0xff]  ;;  %v18_v12 = vld [vmem:[%s518_s0 + $0x20] sm:$0xff]  ;;  %v27_v15 = vld [vmem:[%s518_s0 + $0x68] sm:$0xff] }
   0x6   :  { %318 = vmatprep.subr.mxu0 %v31_v2  ;;  %348 = vmatprep.subr.mxu1 %v31_v2  ;;  %v26_v13 = vld [vmem:[%s518_s0 + $0x60] sm:$0xff]  ;;  %v20_v16 = vld [vmem:[%s518_s0 + $0x30] sm:$0xff]  ;;  %v21_v18 = vld [vmem:[%s518_s0 + $0x38] sm:$0xff] }
   0x7   :  { %319 = vmatpush3.msra.mxu0 %v31_v2  ;;  %352 = vmatpush3.msra.mxu1 %v31_v2  ;;  %v28_v17 = vld [vmem:[%s518_s0 + $0x70] sm:$0xff]  ;;  %v29_v19 = vld [vmem:[%s518_s0 + $0x78] sm:$0xff]  ;;  %v276_v20 = vld [vmem:[%s519_s2] ss:$0 sm:$0xff] }
   0x8   :  { %320 = vmatprep.subr.mxu0 %v30_v3  ;;  %349 = vmatprep.subr.mxu1 %v30_v3 }
   0x9   :  { %321 = vmatpush3.msra.mxu0 %v30_v3  ;;  %353 = vmatpush3.msra.mxu1 %v30_v3 }
   0xa   :  { %322 = vmatprep.mubr.msk.f32.mxu0 %vm41_vm1, %v14_v4  ;;  %334 = vmatprep.mubr.msk.f32.mxu1 %vm41_vm1, %v22_v5 }
   0xb   :  { %323 = vmatmul.mubr.msk.f32.vlgmr.msra.gmra.mxu0 %vm41_vm1, %v15_v6  ;;  %335 = vmatmul.mubr.msk.f32.vlgmr.msra.gmra.mxu1 %vm41_vm1, %v23_v7 }
   0xc   :  { %325 = vmatprep.mubr.msk.f32.mxu0 %vm41_vm1, %v16_v8  ;;  %337 = vmatprep.mubr.msk.f32.mxu1 %vm41_vm1, %v24_v9 }
   0xf   :  { %326 = vmatmul.mubr.msk.f32.gmra.mxu0 %vm41_vm1, %v17_v10  ;;  %338 = vmatmul.mubr.msk.f32.gmra.mxu1 %vm41_vm1, %v25_v11 }
  0x10   :  { %328 = vmatprep.mubr.msk.f32.mxu0 %vm41_vm1, %v18_v12  ;;  %340 = vmatprep.mubr.msk.f32.mxu1 %vm41_vm1, %v26_v13 }
  0x13   :  { %329 = vmatmul.mubr.msk.f32.gmra.mxu0 %vm41_vm1, %v19_v14  ;;  %341 = vmatmul.mubr.msk.f32.gmra.mxu1 %vm41_vm1, %v27_v15 }
  0x14   :  { %331 = vmatprep.mubr.msk.f32.mxu0 %vm41_vm1, %v20_v16  ;;  %343 = vmatprep.mubr.msk.f32.mxu1 %vm41_vm1, %v28_v17 }
  0x17   :  { %332 = vmatmul.mubr.msk.f32.gmra.mxu0 %vm41_vm1, %v21_v18  ;;  %344 = vmatmul.mubr.msk.f32.gmra.mxu1 %vm41_vm1, %v29_v19 }
  0xcb   :  { %v324_v21 = vpop.f32.mrf.mxu0  ;;  %v336_v22 = vpop.f32.mrf.mxu1 }
  0xcc   :  { %v166_v23 = vadd.f32 %v324_v21, %v276_v20  ;;  %v206_v24 = vadd.f32 %v336_v22, %v276_v20 }
  0xcd   :  { %v160_v25 = vpop.f32.mrf.mxu0  ;;  %v200_v26 = vpop.f32.mrf.mxu1 }
  0xce   :  { %v240_v27 = vmax.f32 %v166_v23, 0.0  ;;  %v248_v28 = vmax.f32 %v206_v24, 0.0  ;;  %v161_v29 = vadd.f32 %v276_v20, %v160_v25  ;;  %v201_v30 = vadd.f32 %v276_v20, %v200_v26 }
  0xcf   :  { %v327_v31 = vpop.f32.mrf.mxu0  ;;  %v339_v32 = vpop.f32.mrf.mxu1 }
  0xd0   :  { %257 = vst.msk [vmem:[%s520_s3 + $0x8] sm:$0xff] %vm255_vm2, %v240_v27  ;;  %265 = vst.msk [vmem:[%s520_s3 + $0x48] sm:$0xff] %vm255_vm2, %v248_v28  ;;  %v239_v33 = vmax.f32 %v161_v29, 0.0  ;;  %v247_v34 = vmax.f32 %v201_v30, 0.0  ;;  %v176_v35 = vadd.f32 %v327_v31, %v276_v20  ;;  %v216_v36 = vadd.f32 %v339_v32, %v276_v20 }
  0xd1   :  { %v170_v37 = vpop.f32.mrf.mxu0  ;;  %v210_v38 = vpop.f32.mrf.mxu1 }
  0xd2   :  { %256 = vst.msk [vmem:[%s520_s3] sm:$0xff] %vm255_vm2, %v239_v33  ;;  %264 = vst.msk [vmem:[%s520_s3 + $0x40] sm:$0xff] %vm255_vm2, %v247_v34  ;;  %v242_v39 = vmax.f32 %v176_v35, 0.0  ;;  %v250_v40 = vmax.f32 %v216_v36, 0.0  ;;  %v171_v41 = vadd.f32 %v276_v20, %v170_v37  ;;  %v211_v42 = vadd.f32 %v276_v20, %v210_v38 }
  0xd3   :  { %v330_v43 = vpop.f32.mrf.mxu0  ;;  %v342_v44 = vpop.f32.mrf.mxu1 }
  0xd4   :  { %259 = vst.msk [vmem:[%s520_s3 + $0x18] sm:$0xff] %vm255_vm2, %v242_v39  ;;  %267 = vst.msk [vmem:[%s520_s3 + $0x58] sm:$0xff] %vm255_vm2, %v250_v40  ;;  %v241_v45 = vmax.f32 %v171_v41, 0.0  ;;  %v249_v46 = vmax.f32 %v211_v42, 0.0  ;;  %v186_v47 = vadd.f32 %v330_v43, %v276_v20  ;;  %v226_v48 = vadd.f32 %v342_v44, %v276_v20 }
  0xd5   :  { %v180_v49 = vpop.f32.mrf.mxu0  ;;  %v220_v50 = vpop.f32.mrf.mxu1 }
  0xd6   :  { %258 = vst.msk [vmem:[%s520_s3 + $0x10] sm:$0xff] %vm255_vm2, %v241_v45  ;;  %266 = vst.msk [vmem:[%s520_s3 + $0x50] sm:$0xff] %vm255_vm2, %v249_v46  ;;  %v244_v51 = vmax.f32 %v186_v47, 0.0  ;;  %v252_v52 = vmax.f32 %v226_v48, 0.0  ;;  %v181_v53 = vadd.f32 %v276_v20, %v180_v49  ;;  %v221_v54 = vadd.f32 %v276_v20, %v220_v50 }
  0xd7   :  { %v333_v55 = vpop.f32.mrf.mxu0  ;;  %v345_v56 = vpop.f32.mrf.mxu1 }
  0xd8   :  { %261 = vst.msk [vmem:[%s520_s3 + $0x28] sm:$0xff] %vm255_vm2, %v244_v51  ;;  %269 = vst.msk [vmem:[%s520_s3 + $0x68] sm:$0xff] %vm255_vm2, %v252_v52  ;;  %v243_v57 = vmax.f32 %v181_v53, 0.0  ;;  %v251_v58 = vmax.f32 %v221_v54, 0.0  ;;  %v196_v59 = vadd.f32 %v333_v55, %v276_v20  ;;  %v236_v60 = vadd.f32 %v345_v56, %v276_v20 }
  0xd9   :  { %v190_v61 = vpop.f32.mrf.mxu0  ;;  %v230_v62 = vpop.f32.mrf.mxu1 }
  0xda   :  { %260 = vst.msk [vmem:[%s520_s3 + $0x20] sm:$0xff] %vm255_vm2, %v243_v57  ;;  %268 = vst.msk [vmem:[%s520_s3 + $0x60] sm:$0xff] %vm255_vm2, %v251_v58  ;;  %v246_v63 = vmax.f32 %v196_v59, 0.0  ;;  %v254_v0 = vmax.f32 %v236_v60, 0.0  ;;  %v191_v1 = vadd.f32 %v276_v20, %v190_v61  ;;  %v231_v2 = vadd.f32 %v276_v20, %v230_v62 }
  0xdc   :  { %263 = vst.msk [vmem:[%s520_s3 + $0x38] sm:$0xff] %vm255_vm2, %v246_v63  ;;  %271 = vst.msk [vmem:[%s520_s3 + $0x78] sm:$0xff] %vm255_vm2, %v254_v0  ;;  %v245_v3 = vmax.f32 %v191_v1, 0.0  ;;  %v253_v4 = vmax.f32 %v231_v2, 0.0 }
  0xde   :  { %262 = vst.msk [vmem:[%s520_s3 + $0x30] sm:$0xff] %vm255_vm2, %v245_v3  ;;  %270 = vst.msk [vmem:[%s520_s3 + $0x70] sm:$0xff] %vm255_vm2, %v253_v4 }

</bundles_post_ra>
